<compile_context>
chip_gen: v7x
topology: tpu7x:2x2x1
jax: 0.10.0
libtpu: 0.0.40
codegen_flags: <defaults>
</compile_context>

<pallas_src>
import functools

import jax
import jax.numpy as jnp
from jax.experimental import pallas as pl
from jax.experimental.pallas import tpu as pltpu


def _round_up(x, m):
    return ((x + m - 1) // m) * m


def _bf16_vpu_available():
    """bf16 VPU/EUP exists on v6e/v7x; v5-and-older promote bf16 back to f32."""
    try:
        kind = jax.devices()[0].device_kind.lower()
    except Exception:
        return True
    return not any(f"v{g}" in kind for g in (2, 3, 4, 5))


def encoder_kernel(x_ref, w1_ref, b1_ref, wh_ref, bh_ref, out_ref, *,
                   z, bf16_hidden):
    # x_ref: [TILE_B, 784] f32; w1_ref: [784, H_pad] bf16;
    # wh_ref: [H_pad, Z2_pad] bf16 (fused [mu | sigma] heads); biases f32.
    x = x_ref[...].astype(w1_ref.dtype)                 # f32 -> bf16 in VMEM

    # Hidden layer: bf16 MXU matmul with f32 accumulation, then bias + tanh.
    acc = jnp.dot(x, w1_ref[...], preferred_element_type=jnp.float32)
    acc = acc + b1_ref[...]
    if bf16_hidden:
        h = jnp.tanh(acc.astype(jnp.bfloat16))          # bf16 EUP (v6e/v7x)
    else:
        h = jnp.tanh(acc).astype(wh_ref.dtype)          # f32 EUP (v5-class)

    # Fused heads: one matmul over the concatenated [mu | sigma] weights.
    a = jnp.dot(h, wh_ref[...], preferred_element_type=jnp.float32)
    a = a + bh_ref[...]                                 # [TILE_B, Z2_pad] f32

    # One EUP pass for both nonlinearities:
    #   lanes [0, z)  : tanh(a)    = 2*sigmoid(2a) - 1   (mean head)
    #   lanes [z, 2z) : sigmoid(a)                       (std head)
    # Padded lanes >= 2z carry junk and are sliced away outside the kernel.
    col = jax.lax.broadcasted_iota(jnp.int32, a.shape, 1)
    is_mean = col < z
    s = jax.nn.sigmoid(jnp.where(is_mean, 2.0 * a, a))
    out_ref[...] = jnp.where(is_mean, 2.0 * s - 1.0, s).astype(out_ref.dtype)


def prepare_params(params, compute_dtype=jnp.bfloat16):
    """One-time weight prep (NOT per-forward): transpose to [in, out], fuse the
    two heads, zero-pad only the hidden / head-output dims to multiples of 128,
    cast weights to bf16 (biases stay f32, added after the f32 accumulation).
    The K=784 axis is left unpadded: full-extent lane blocks are legal and this
    cuts w1 HBM bytes and x DMA bytes vs. padding K to 896."""
    w1 = params["w1"]                      # [hidden, 784]
    hidden, in_dim = w1.shape
    z = params["w_mu"].shape[0]

    h_pad = _round_up(hidden, 128)
    z2_pad = _round_up(2 * z, 128)

    w1_p = (jnp.zeros((in_dim, h_pad), compute_dtype)
            .at[:, :hidden].set(w1.T.astype(compute_dtype)))
    b1_p = jnp.zeros((1, h_pad), jnp.float32).at[0, :hidden].set(params["b1"])

    wh = jnp.concatenate([params["w_mu"].T, params["w_sigma"].T], axis=1)
    wh_p = (jnp.zeros((h_pad, z2_pad), compute_dtype)
            .at[:hidden, :2 * z].set(wh.astype(compute_dtype)))
    bh = jnp.concatenate([params["b_mu"], params["b_sigma"]])
    bh_p = jnp.zeros((1, z2_pad), jnp.float32).at[0, :2 * z].set(bh)

    return dict(w1=w1_p, b1=b1_p, wh=wh_p, bh=bh_p,
                z=z, hidden=hidden, in_dim=in_dim, h_pad=h_pad, z2_pad=z2_pad,
                bf16_hidden=_bf16_vpu_available())


def encoder_forward(x, prep, max_tile_b=1024):
    """x: [B, 784] float32. prep: output of prepare_params. Returns (mean, std)."""
    B, in_dim = x.shape
    assert in_dim == prep["in_dim"]
    z, h_pad, z2_pad = prep["z"], prep["h_pad"], prep["z2_pad"]

    # Batch tiling: a single full-extent block (no pad, no copy of x) when the
    # batch fits one tile; otherwise equal tiles on a 16-row granule (bf16
    # sublane pack) with >= 2 grid steps so both v7x TensorCores get work.
    n_steps = -(-B // max_tile_b)
    if n_steps <= 1:
        tile_b, b_pad, xp = B, B, x
    else:
        tile_b = _round_up(-(-B // n_steps), 16)
        b_pad = tile_b * n_steps
        xp = jnp.pad(x, ((0, b_pad - B), (0, 0))) if b_pad != B else x

    kernel = functools.partial(encoder_kernel, z=z,
                               bf16_hidden=prep["bf16_hidden"])

    weight_bytes = (in_dim * h_pad + h_pad * z2_pad) * 2 + (h_pad + z2_pad) * 4
    cost = pl.CostEstimate(
        flops=2 * b_pad * (in_dim * h_pad + h_pad * z2_pad),
        transcendentals=b_pad * (h_pad + z2_pad),
        bytes_accessed=b_pad * in_dim * 4 + weight_bytes + b_pad * z2_pad * 2,
    )

    out = pl.pallas_call(
        kernel,
        out_shape=jax.ShapeDtypeStruct((b_pad, z2_pad), jnp.bfloat16),
        grid=(b_pad // tile_b,),
        in_specs=[
            pl.BlockSpec((tile_b, in_dim), lambda i: (i, 0)),  # x: tiled over batch
            pl.BlockSpec((in_dim, h_pad), lambda i: (0, 0)),   # weights: VMEM-resident
            pl.BlockSpec((1, h_pad), lambda i: (0, 0)),
            pl.BlockSpec((h_pad, z2_pad), lambda i: (0, 0)),
            pl.BlockSpec((1, z2_pad), lambda i: (0, 0)),
        ],
        out_specs=pl.BlockSpec((tile_b, z2_pad), lambda i: (i, 0)),
        compiler_params=pltpu.CompilerParams(
            dimension_semantics=("parallel",),
            vmem_limit_bytes=32 << 20,
        ),
        cost_estimate=cost,
    )(xp, prep["w1"], prep["b1"], prep["wh"], prep["bh"])

    mean = out[:B, :z].astype(jnp.float32)
    std = out[:B, z:2 * z].astype(jnp.float32)
    return mean, std


def init_params(key, hidden_dim=500, z_dim=20, in_dim=784):
    """PyTorch nn.Linear default init: U[-1/sqrt(fan_in), 1/sqrt(fan_in)]."""
    ks = jax.random.split(key, 6)

    def lin(kw, kb, fan_in, fan_out):
        bound = 1.0 / jnp.sqrt(fan_in)
        w = jax.random.uniform(kw, (fan_out, fan_in), jnp.float32, -bound, bound)
        b = jax.random.uniform(kb, (fan_out,), jnp.float32, -bound, bound)
        return w, b

    w1, b1 = lin(ks[0], ks[1], in_dim, hidden_dim)
    w_mu, b_mu = lin(ks[2], ks[3], hidden_dim, z_dim)
    w_sigma, b_sigma = lin(ks[4], ks[5], hidden_dim, z_dim)
    return {"w1": w1, "b1": b1, "w_mu": w_mu, "b_mu": b_mu,
            "w_sigma": w_sigma, "b_sigma": b_sigma}


if __name__ == "__main__":
    key = jax.random.PRNGKey(0)
    k_x, k_p = jax.random.split(key)

    B, hidden_dim, z_dim = 8, 64, 20   # small demo shapes; in_dim fixed at 784
    params = init_params(k_p, hidden_dim=hidden_dim, z_dim=z_dim, in_dim=784)
    x = jax.random.uniform(k_x, (B, 784), jnp.float32)   # MNIST-like pixels

    prep = prepare_params(params)                         # one-time weight prep
    mean, std = encoder_forward(x, prep)
    jax.block_until_ready((mean, std))

    # Reference in plain f32 JAX (same math as the PyTorch forward).
    h_ref = jnp.tanh(x @ params["w1"].T + params["b1"])
    mean_ref = jnp.tanh(h_ref @ params["w_mu"].T + params["b_mu"])
    std_ref = jax.nn.sigmoid(h_ref @ params["w_sigma"].T + params["b_sigma"])

    assert mean.shape == (B, z_dim) and std.shape == (B, z_dim)
    # bf16 weights / activations / output (f32 accumulation) -> relaxed tol.
    assert jnp.allclose(mean, mean_ref, atol=3e-2)
    assert jnp.allclose(std, std_ref, atol=3e-2)
    assert bool(jnp.all(std > 0.0))

    print("KERNEL_OK")
</pallas_src>

<mosaic_0001>
module attributes {stable_mosaic.version = 11 : i64} {
  func.func @encoder_kernel(%arg0: i32, %arg1: memref<8x784xf32, #tpu.memory_space<vmem>>, %arg2: memref<784x128xbf16, #tpu.memory_space<vmem>>, %arg3: memref<1x128xf32, #tpu.memory_space<vmem>>, %arg4: memref<128x128xbf16, #tpu.memory_space<vmem>>, %arg5: memref<1x128xf32, #tpu.memory_space<vmem>>, %arg6: memref<8x128xbf16, #tpu.memory_space<vmem>>) attributes {dimension_semantics = [#tpu.dimension_semantics<parallel>], iteration_bounds = array<i64: 1>, scalar_prefetch = 0 : i64, scratch_operands = 0 : i64, tpu.core_type = #tpu.core_type<tc>, window_params = [{transform_indices = @transform_0, window_bounds = array<i64: 8, 784>}, {pipeline_mode = #tpu.pipeline_mode<synchronous>, transform_indices = @transform_1, window_bounds = array<i64: 784, 128>}, {pipeline_mode = #tpu.pipeline_mode<synchronous>, transform_indices = @transform_2, window_bounds = array<i64: 1, 128>}, {pipeline_mode = #tpu.pipeline_mode<synchronous>, transform_indices = @transform_3, window_bounds = array<i64: 128, 128>}, {pipeline_mode = #tpu.pipeline_mode<synchronous>, transform_indices = @transform_4, window_bounds = array<i64: 1, 128>}, {transform_indices = @transform_5, window_bounds = array<i64: 8, 128>}]} {
    %c0 = arith.constant 0 : index
    %c0_0 = arith.constant 0 : index
    %0 = vector.load %arg1[%c0, %c0_0] : memref<8x784xf32, #tpu.memory_space<vmem>>, vector<8x784xf32>
    %1 = arith.truncf %0 : vector<8x784xf32> to vector<8x784xbf16>
    %c0_1 = arith.constant 0 : index
    %c0_2 = arith.constant 0 : index
    %2 = vector.load %arg2[%c0_1, %c0_2] : memref<784x128xbf16, #tpu.memory_space<vmem>>, vector<784x128xbf16>
    %cst = arith.constant dense<0.000000e+00> : vector<8x128xf32>
    %3 = tpu.matmul %1, %2, %cst {dimension_numbers = #tpu.dot_dimension_numbers<[1], [0], [0], [1], [0, 0, 1, 1], [], []>} : vector<8x784xbf16>, vector<784x128xbf16>, vector<8x128xf32> -> vector<8x128xf32>
    %c0_3 = arith.constant 0 : index
    %c0_4 = arith.constant 0 : index
    %4 = vector.load %arg3[%c0_3, %c0_4] : memref<1x128xf32, #tpu.memory_space<vmem>>, vector<1x128xf32>
    %5 = vector.broadcast %4 : vector<1x128xf32> to vector<8x128xf32>
    %6 = arith.addf %3, %5 : vector<8x128xf32>
    %7 = arith.truncf %6 : vector<8x128xf32> to vector<8x128xbf16>
    %8 = math.tanh %7 : vector<8x128xbf16>
    %c0_5 = arith.constant 0 : index
    %c0_6 = arith.constant 0 : index
    %9 = vector.load %arg4[%c0_5, %c0_6] : memref<128x128xbf16, #tpu.memory_space<vmem>>, vector<128x128xbf16>
    %cst_7 = arith.constant dense<0.000000e+00> : vector<8x128xf32>
    %10 = tpu.matmul %8, %9, %cst_7 {dimension_numbers = #tpu.dot_dimension_numbers<[1], [0], [0], [1], [0, 0, 1, 1], [], []>} : vector<8x128xbf16>, vector<128x128xbf16>, vector<8x128xf32> -> vector<8x128xf32>
    %c0_8 = arith.constant 0 : index
    %c0_9 = arith.constant 0 : index
    %11 = vector.load %arg5[%c0_8, %c0_9] : memref<1x128xf32, #tpu.memory_space<vmem>>, vector<1x128xf32>
    %12 = vector.broadcast %11 : vector<1x128xf32> to vector<8x128xf32>
    %13 = arith.addf %10, %12 : vector<8x128xf32>
    %14 = tpu.iota {dimensions = array<i32: 1>} : vector<8x128xi32>
    %c20_i32 = arith.constant 20 : i32
    %15 = vector.broadcast %c20_i32 : i32 to vector<8x128xi32>
    %16 = arith.cmpi slt, %14, %15 : vector<8x128xi32>
    %cst_10 = arith.constant 2.000000e+00 : f32
    %17 = vector.broadcast %cst_10 : f32 to vector<8x128xf32>
    %18 = arith.mulf %17, %13 : vector<8x128xf32>
    %19 = arith.select %16, %18, %13 : vector<8x128xi1>, vector<8x128xf32>
    %20 = arith.negf %19 : vector<8x128xf32>
    %21 = math.exp %20 : vector<8x128xf32>
    %cst_11 = arith.constant 1.000000e+00 : f32
    %22 = vector.broadcast %cst_11 : f32 to vector<8x128xf32>
    %23 = arith.addf %22, %21 : vector<8x128xf32>
    %24 = arith.divf %22, %23 : vector<8x128xf32>
    %cst_12 = arith.constant 2.000000e+00 : f32
    %25 = vector.broadcast %cst_12 : f32 to vector<8x128xf32>
    %26 = arith.mulf %25, %24 : vector<8x128xf32>
    %cst_13 = arith.constant 1.000000e+00 : f32
    %27 = vector.broadcast %cst_13 : f32 to vector<8x128xf32>
    %28 = arith.subf %26, %27 : vector<8x128xf32>
    %29 = arith.select %16, %28, %24 : vector<8x128xi1>, vector<8x128xf32>
    %30 = arith.truncf %29 : vector<8x128xf32> to vector<8x128xbf16>
    %c0_14 = arith.constant 0 : index
    %c0_15 = arith.constant 0 : index
    %31 = vector.load %arg6[%c0_14, %c0_15] : memref<8x128xbf16, #tpu.memory_space<vmem>>, vector<8x128xbf16>
    tpu.vector_store %arg6[%c0_14, %c0_15], %30 {strides = array<i32>} : memref<8x128xbf16, #tpu.memory_space<vmem>>, vector<8x128xbf16>,
    return
  }
  func.func @transform_0(%arg0: i32) -> (i32, i32) {
    %c0_i32 = arith.constant 0 : i32
    %c0_i32_0 = arith.constant 0 : i32
    return %arg0, %c0_i32 : i32, i32
  }
  func.func @transform_1(%arg0: i32) -> (i32, i32) {
    %c0_i32 = arith.constant 0 : i32
    %c0_i32_0 = arith.constant 0 : i32
    %c0_i32_1 = arith.constant 0 : i32
    return %c0_i32, %c0_i32_0 : i32, i32
  }
  func.func @transform_2(%arg0: i32) -> (i32, i32) {
    %c0_i32 = arith.constant 0 : i32
    %c0_i32_0 = arith.constant 0 : i32
    %c0_i32_1 = arith.constant 0 : i32
    return %c0_i32, %c0_i32_0 : i32, i32
  }
  func.func @transform_3(%arg0: i32) -> (i32, i32) {
    %c0_i32 = arith.constant 0 : i32
    %c0_i32_0 = arith.constant 0 : i32
    %c0_i32_1 = arith.constant 0 : i32
    return %c0_i32, %c0_i32_0 : i32, i32
  }
  func.func @transform_4(%arg0: i32) -> (i32, i32) {
    %c0_i32 = arith.constant 0 : i32
    %c0_i32_0 = arith.constant 0 : i32
    %c0_i32_1 = arith.constant 0 : i32
    return %c0_i32, %c0_i32_0 : i32, i32
  }
  func.func @transform_5(%arg0: i32) -> (i32, i32) {
    %c0_i32 = arith.constant 0 : i32
    %c0_i32_0 = arith.constant 0 : i32
    return %arg0, %c0_i32 : i32, i32
  }
}

</mosaic_0001>

<bundles_post_ra>
// kernel: tpu_custom_call.1
= control target key start
LH: loop header
LB: loop body
LE: loop exit
PB: predicated region body
PF: predicated region fallthrough
CT: control target
= control target key end

     0   :  { %10 = vsyncpa [#allocation3], 0  ;;  %s1224_s0 = inlined_call_operand.hbm [shape: f32[8,784], index: 0, kind: input, shape index: {}]   ;;  %s1225_s1 = inlined_call_operand.hbm [shape: bf16[784,128], index: 1, kind: input, shape index: {}]   ;;  %s1226_s2 = inlined_call_operand.vmem [shape: f32[1,128], index: 2, kind: input, shape index: {}]   ;;  %s1227_s3 = inlined_call_operand.hbm [shape: bf16[128,128], index: 3, kind: input, shape index: {}]   ;;  %s1228_s4 = inlined_call_operand.vmem [shape: f32[1,128], index: 4, kind: input, shape index: {}]   ;;  %s1229_s5 = inlined_call_operand.hbm [shape: bf16[8,128], index: 5, kind: output, shape index: {}]  }
   0x1   :  { %11 = vsyncpa [#allocation6], 0 }
   0x2   :  { %12 = vsyncpa [#allocation4], 0  ;;  %s1113_s18 = smov [#allocation5]   ;;  %s1019_s22 = scalar_lea.hbm %s1225_s1, 6272 }
   0x3   :  { %s28_s19 = sshll.u32 %s1113_s18, 4  ;;  %p1020_p0 = scmp.ne.s32.totalorder %s1225_s1, %s1019_s22  ;;  %s29_s19 = int_to_ptr.vmem [resolvable:$true] %s28_s19 }
   0x4   :  { %p1023_p1 = scmp.lt.u32.totalorder %s1019_s22, %s1225_s1 }
   0x6   :  { %p1025_p2 = pnand %p1023_p1, %p1020_p0 }
   0x8   :  { %1028 = shalt.err (!%p1025_p2)
}
   0x9   :  { %s1029_s27 = scalar_lea.vmem %s29_s19, 6272  ;;  %p1034_p4 = scmp.lt.s32.totalorder %s29_s19, %s29_s19 }
   0xa   :  { %p1030_p3 = scmp.ne.s32.totalorder %s29_s19, %s1029_s27  ;;  %p1035_p5 = scmp.lt.s32.totalorder %s1029_s27, %s1029_s27 }
   0xc   :  { %p1036_p6 = por %p1035_p5, %p1034_p4 }
   0xe   :  { %p1037_p7 = pnand %p1036_p6, %p1030_p3 }
  0x10   :  { %1040 = shalt.err (!%p1037_p7)
}
  0x11   :  { %s1114_s28 = smov 64   ;;  %s1115_s29 = smov 4  }
  0x12   :  { %34 = dma.hbm_to_vmem [thread:$0]  %s1225_s1, 6272, %s29_s19, [#allocation6], %s1114_s28, %s1114_s28, %s1115_s29  }
  0x13   :  { %s1116_s7 = smov [#allocation2]   ;;  %s1117_s9 = smov [#allocation7]  }
  0x14   :  { %s19_s8 = sshll.u32 %s1116_s7, 4  ;;  %s42_s10 = sshll.u32 %s1117_s9, 4  ;;  %s20_s8 = int_to_ptr.vmem [resolvable:$true] %s19_s8  ;;  %s43_s10 = int_to_ptr.vmem [resolvable:$true] %s42_s10 }
  0x15   :  { %s1041_s13 = scalar_lea.hbm %s1224_s0, 896 }
  0x16   :  { %p1042_p8 = scmp.ne.s32.totalorder %s1224_s0, %s1041_s13  ;;  %p1045_p9 = scmp.lt.u32.totalorder %s1041_s13, %s1224_s0 }
  0x18   :  { %p1047_p10 = pnand %p1045_p9, %p1042_p8 }
  0x1a   :  { %1050 = shalt.err (!%p1047_p10)
}
  0x1b   :  { %s1051_s1 = scalar_lea.vmem %s20_s8, 896  ;;  %p1056_p12 = scmp.lt.s32.totalorder %s20_s8, %s20_s8 }
  0x1c   :  { %p1052_p11 = scmp.ne.s32.totalorder %s20_s8, %s1051_s1  ;;  %p1057_p13 = scmp.lt.s32.totalorder %s1051_s1, %s1051_s1 }
  0x1e   :  { %p1058_p0 = por %p1057_p13, %p1056_p12 }
  0x20   :  { %p1059_p1 = pnand %p1058_p0, %p1052_p11 }
  0x22   :  { %1062 = shalt.err (!%p1059_p1)
}
  0x23   :  { %22 = dma.hbm_to_vmem [thread:$0]  %s1224_s0, 896, %s20_s8, [#allocation3]  }
  0x24   :  { %s1063_s22 = scalar_lea.hbm %s1227_s3, 1024 }
  0x25   :  { %p1064_p2 = scmp.ne.s32.totalorder %s1227_s3, %s1063_s22  ;;  %p1067_p3 = scmp.lt.u32.totalorder %s1063_s22, %s1227_s3 }
  0x27   :  { %p1069_p4 = pnand %p1067_p3, %p1064_p2 }
  0x29   :  { %1072 = shalt.err (!%p1069_p4)
}
  0x2a   :  { %s1073_s27 = scalar_lea.vmem %s43_s10, 1024  ;;  %p1078_p6 = scmp.lt.s32.totalorder %s43_s10, %s43_s10 }
  0x2b   :  { %p1074_p5 = scmp.ne.s32.totalorder %s43_s10, %s1073_s27  ;;  %p1079_p7 = scmp.lt.s32.totalorder %s1073_s27, %s1073_s27 }
  0x2d   :  { %p1080_p8 = por %p1079_p7, %p1078_p6 }
  0x2f   :  { %p1081_p9 = pnand %p1080_p8, %p1074_p5 }
  0x31   :  { %1084 = shalt.err (!%p1081_p9)
}
  0x32   :  { %48 = dma.hbm_to_vmem [thread:$0]  %s1227_s3, 1024, %s43_s10, [#allocation6], %s1114_s28, %s1114_s28, %s1115_s29  }
  0x33   :  { %1107 = dma.done.wait [#allocation3], 896  }
  0x34   :  { %1108 = vsyncadd [#allocation3], 4294966400 }
  0x35   :  { %1109 = dma.done.wait [#allocation6], 7296  }
  0x36   :  { %1110 = vsyncadd [#allocation6], 4294960000  ;;  %v956_v0 = vld [vmem:[#allocation5 + $0x40] sm:$0xff]   ;;  %v960_v4 = vld [vmem:[#allocation5 + $0x48] sm:$0xff]   ;;  %v1118_v44 = vmov 0.0   ;;  %vm1119_vm0 = vmmov 0  }
  0x37   :  { %v957_v1 = vld [vmem:[#allocation5] sm:$0xff]   ;;  %845 = vmatprep.subr.bf16.mxu0 %v956_v0  ;;  %v961_v5 = vld [vmem:[#allocation5 + $0x8] sm:$0xff]   ;;  %v964_v8 = vld [vmem:[#allocation5 + $0x50] sm:$0xff]   ;;  %vm474_vm1 = vcmask 130048   ;;  %s1120_s6 = smov [#allocation8]  }
  0x38   :  { %v958_v2 = vld [vmem:[#allocation5 + $0xc0] sm:$0xff]   ;;  %846 = vmatpush3.bf16.msra.mxu0 %v957_v1  ;;  %v962_v6 = vld [vmem:[#allocation5 + $0xc8] sm:$0xff]   ;;  %v965_v9 = vld [vmem:[#allocation5 + $0x10] sm:$0xff]   ;;  %s773_s7 = sshll.u32 %s1120_s6, 4  ;;  %s774_s7 = int_to_ptr.vmem [resolvable:$true] %s773_s7 }
  0x39   :  { %v959_v3 = vld [vmem:[#allocation5 + $0x80] sm:$0xff]   ;;  %867 = vmatprep.subr.bf16.mxu1 %v958_v2  ;;  %847 = vmatprep.subr.bf16.mxu0 %v960_v4  ;;  %v963_v7 = vld [vmem:[#allocation5 + $0x88] sm:$0xff]   ;;  %v966_v10 = vld [vmem:[#allocation5 + $0xd0] sm:$0xff]   ;;  %p1090_p11 = scmp.lt.s32.totalorder %s774_s7, %s774_s7 }
  0x3a   :  { %868 = vmatpush3.bf16.msra.mxu1 %v959_v3  ;;  %v967_v11 = vld [vmem:[#allocation5 + $0x90] sm:$0xff]   ;;  %v968_v12 = vld [vmem:[#allocation5 + $0x58] sm:$0xff]   ;;  %v972_v16 = vld [vmem:[#allocation5 + $0x60] sm:$0xff]  }
  0x3b   :  { %869 = vmatprep.subr.bf16.mxu1 %v962_v6  ;;  %v969_v13 = vld [vmem:[#allocation5 + $0x18] sm:$0xff]   ;;  %v973_v17 = vld [vmem:[#allocation5 + $0x20] sm:$0xff]   ;;  %v976_v20 = vld [vmem:[#allocation5 + $0x68] sm:$0xff]  }
  0x3c   :  { %848 = vmatpush3.bf16.msra.mxu0 %v961_v5  ;;  %v970_v14 = vld [vmem:[#allocation5 + $0xd8] sm:$0xff]   ;;  %v974_v18 = vld [vmem:[#allocation5 + $0xe0] sm:$0xff]   ;;  %v977_v21 = vld [vmem:[#allocation5 + $0x28] sm:$0xff]  }
  0x3d   :  { %849 = vmatprep.subr.bf16.mxu0 %v964_v8  ;;  %v971_v15 = vld [vmem:[#allocation5 + $0x98] sm:$0xff]   ;;  %v975_v19 = vld [vmem:[#allocation5 + $0xa0] sm:$0xff]   ;;  %v978_v22 = vld [vmem:[#allocation5 + $0xe8] sm:$0xff]  }
  0x3e   :  { %870 = vmatpush3.bf16.msra.mxu1 %v963_v7  ;;  %v979_v23 = vld [vmem:[#allocation5 + $0xa8] sm:$0xff]   ;;  %v980_v24 = vld [vmem:[#allocation5 + $0x70] sm:$0xff]   ;;  %v984_v28 = vld [vmem:[#allocation5 + $0x78] sm:$0xff]  }
  0x3f   :  { %871 = vmatprep.subr.bf16.mxu1 %v966_v10  ;;  %v981_v25 = vld [vmem:[#allocation5 + $0x30] sm:$0xff]   ;;  %v985_v29 = vld [vmem:[#allocation5 + $0x38] sm:$0xff]   ;;  %v61_v34 = vld [vmem:[#allocation2] sm:$0xff] }
  0x40   :  { %850 = vmatpush3.bf16.msra.mxu0 %v965_v9  ;;  %v982_v26 = vld [vmem:[#allocation5 + $0xf0] sm:$0xff]   ;;  %v986_v30 = vld [vmem:[#allocation5 + $0xf8] sm:$0xff]   ;;  %v68_v35 = vpack.c.bf16 %v61_v34, %v61_v34  ;;  %v988_v36 = vld [vmem:[#allocation5 + $0x140] sm:$0xff]   ;;  %v751_v34 = vlaneseq }
  0x41   :  { %851 = vmatprep.subr.bf16.mxu0 %v968_v12  ;;  %v983_v27 = vld [vmem:[#allocation5 + $0xb0] sm:$0xff]   ;;  %v987_v33 = vld [vmem:[#allocation5 + $0xb8] sm:$0xff]   ;;  %v64_v37 = vld [vmem:[#allocation2 + $0x18] sm:$0xff] }
  0x42   :  { %872 = vmatpush3.bf16.msra.mxu1 %v967_v11  ;;  %v62_v31 = vld [vmem:[#allocation2 + $0x8] sm:$0xff]  ;;  %v71_v38 = vpack.c.bf16 %v64_v37, %v64_v37  ;;  %v989_v39 = vld [vmem:[#allocation5 + $0x100] sm:$0xff]   ;;  %v63_v40 = vld [vmem:[#allocation2 + $0x10] sm:$0xff] }
  0x43   :  { %873 = vmatprep.subr.bf16.mxu1 %v970_v14  ;;  %v69_v32 = vpack.c.bf16 %v62_v31, %v62_v31  ;;  %v70_v41 = vpack.c.bf16 %v63_v40, %v63_v40  ;;  %v990_v42 = vld [vmem:[#allocation5 + $0x148] sm:$0xff]   ;;  %v992_v45 = vld [vmem:[#allocation5 + $0x150] sm:$0xff]   ;;  %v994_v47 = vld [vmem:[#allocation5 + $0x158] sm:$0xff]  }
  0x44   :  { %852 = vmatpush3.bf16.msra.mxu0 %v969_v13  ;;  %550 = vmatprep.mubr.bf16.mxu1 %v71_v38  ;;  %v991_v43 = vld [vmem:[#allocation5 + $0x108] sm:$0xff]   ;;  %v993_v46 = vld [vmem:[#allocation5 + $0x110] sm:$0xff]   ;;  %v995_v48 = vld [vmem:[#allocation5 + $0x118] sm:$0xff]  }
  0x45   :  { %853 = vmatprep.subr.bf16.mxu0 %v972_v16  ;;  %510 = vmatprep.mubr.bf16.mxu0 %v69_v32  ;;  %v996_v49 = vld [vmem:[#allocation5 + $0x160] sm:$0xff]   ;;  %v998_v51 = vld [vmem:[#allocation5 + $0x168] sm:$0xff]   ;;  %v66_v54 = vld [vmem:[#allocation2 + $0x28] sm:$0xff] }
  0x46   :  { %874 = vmatpush3.bf16.msra.mxu1 %v971_v15  ;;  %v997_v50 = vld [vmem:[#allocation5 + $0x120] sm:$0xff]   ;;  %v999_v52 = vld [vmem:[#allocation5 + $0x128] sm:$0xff]   ;;  %v1000_v55 = vld [vmem:[#allocation5 + $0x170] sm:$0xff]   ;;  %v73_v56 = vpack.c.bf16 %v66_v54, %v66_v54 }
  0x47   :  { %875 = vmatprep.subr.bf16.mxu1 %v974_v18  ;;  %v1004_v53 = vld [vmem:[#allocation5 + $0x180] sm:$0xff]   ;;  %v67_v57 = vld [vmem:[#allocation2 + $0x30] sm:$0xff]  ;;  %v1001_v59 = vld [vmem:[#allocation5 + $0x130] sm:$0xff]  }
  0x48   :  { %854 = vmatpush3.bf16.msra.mxu0 %v973_v17  ;;  %v74_v58 = vpack.c.bf16 %v67_v57, %v67_v57  ;;  %v1002_v60 = vld [vmem:[#allocation5 + $0x178] sm:$0xff]   ;;  %v65_v62 = vld [vmem:[#allocation2 + $0x20] sm:$0xff]  ;;  %v1006_v1 = vld [vmem:[#allocation7 + $0x8] sm:$0xff]  }
  0x49   :  { %855 = vmatprep.subr.bf16.mxu0 %v976_v20  ;;  %v1003_v61 = vld [vmem:[#allocation5 + $0x138] sm:$0xff]   ;;  %v72_v63 = vpack.c.bf16 %v65_v62, %v65_v62  ;;  %v1005_v0 = vld [vmem:[#allocation7] sm:$0xff]   ;;  %v1008_v3 = vld [vmem:[#allocation7 + $0x18] sm:$0xff]  }
  0x4a   :  { %876 = vmatpush3.bf16.msra.mxu1 %v975_v19  ;;  %v1007_v2 = vld [vmem:[#allocation7 + $0x10] sm:$0xff]   ;;  %v1009_v4 = vld [vmem:[#allocation7 + $0x20] sm:$0xff]   ;;  %v1010_v5 = vld [vmem:[#allocation7 + $0x28] sm:$0xff]  }
  0x4b   :  { %877 = vmatprep.subr.bf16.mxu1 %v978_v22  ;;  %v1011_v6 = vld [vmem:[#allocation7 + $0x30] sm:$0xff]   ;;  %v1012_v7 = vld [vmem:[#allocation7 + $0x38] sm:$0xff]   ;;  %v783_v9 = vld [vmem:[%s1226_s2] ss:$0 sm:$0xff] }
  0x4c   :  { %856 = vmatpush3.bf16.msra.mxu0 %v977_v21 }
  0x4d   :  { %857 = vmatprep.subr.bf16.mxu0 %v980_v24 }
  0x4e   :  { %878 = vmatpush3.bf16.msra.mxu1 %v979_v23 }
  0x4f   :  { %879 = vmatprep.subr.bf16.mxu1 %v982_v26 }
  0x50   :  { %858 = vmatpush3.bf16.msra.mxu0 %v981_v25 }
  0x51   :  { %859 = vmatprep.subr.bf16.mxu0 %v984_v28 }
  0x52   :  { %880 = vmatpush3.bf16.msra.mxu1 %v983_v27 }
  0x53   :  { %881 = vmatprep.subr.bf16.mxu1 %v986_v30 }
  0x54   :  { %860 = vmatpush3.bf16.msra.mxu0 %v985_v29 }
  0x55   :  { %889 = vmatprep.subr.bf16.mxu0 %v988_v36  ;;  %v752_v36 = vand.u32 127, %v751_v34 }
  0x56   :  { %882 = vmatpush3.bf16.msra.mxu1 %v987_v33 }
  0x57   :  { %511 = vmatmul.mubr.bf16.vlgmr.msra.gmra.mrb[0].mxu0 %v68_v35  ;;  %922 = vmatprep.subr.bf16.mxu1 %v1118_v44  ;;  %v834_v35 = vld [vmem:[%s1228_s4] ss:$0 sm:$0xff]  ;;  %vm753_vm2 = vcmp.lt.s32.totalorder %v752_v36, 20  ;;  %s1085_s4 = scalar_lea.vmem %s774_s7, 64 }
  0x58   :  { %890 = vmatpush3.bf16.msra.mxu0 %v989_v39  ;;  %590 = vmatprep.mubr.bf16.mxu0 %v73_v56  ;;  %p1086_p10 = scmp.ne.s32.totalorder %s774_s7, %s1085_s4  ;;  %p1091_p12 = scmp.lt.s32.totalorder %s1085_s4, %s1085_s4 }
  0x59   :  { %551 = vmatmul.mubr.bf16.vlgmr.msra.gmra.mrb[0].mxu1 %v70_v41  ;;  %891 = vmatprep.subr.bf16.mxu0 %v990_v42 }
  0x5a   :  { %924 = vmatprep.mubr.msk.bf16.mxu1 %vm1119_vm0, %v1118_v44  ;;  %923 = vmatpush3.bf16.msra.mxu1 %v1004_v53  ;;  %p1092_p13 = por %p1091_p12, %p1090_p11 }
  0x5b   :  { %928 = vmatprep.subr.bf16.mxu1 %v1118_v44 }
  0x5c   :  { %892 = vmatpush3.bf16.msra.mxu0 %v991_v43  ;;  %p1093_p0 = pnand %p1092_p13, %p1086_p10 }
  0x5d   :  { %893 = vmatprep.subr.bf16.mxu0 %v992_v45 }
  0x60   :  { %894 = vmatpush3.bf16.msra.mxu0 %v993_v46 }
  0x61   :  { %895 = vmatprep.subr.bf16.mxu0 %v994_v47  ;;  %925 = vmatmul.mubr.msk.bf16.vlgmr.msra.gmra.mrb[4].mxu1 %vm474_vm1, %v74_v58 }
  0x62   :  { %944 = vmatprep.mubr.msk.bf16.mxu1 %vm1119_vm0, %v1118_v44  ;;  %929 = vmatpush3.bf16.msra.mxu1 %v1005_v0 }
  0x63   :  { %930 = vmatprep.subr.bf16.mxu1 %v1118_v44 }
  0x64   :  { %896 = vmatpush3.bf16.msra.mxu0 %v995_v48 }
  0x65   :  { %897 = vmatprep.subr.bf16.mxu0 %v996_v49 }
  0x66   :  { %931 = vmatpush3.bf16.msra.mxu1 %v1006_v1 }
  0x67   :  { %932 = vmatprep.subr.bf16.mxu1 %v1118_v44 }
  0x68   :  { %898 = vmatpush3.bf16.msra.mxu0 %v997_v50 }
  0x69   :  { %899 = vmatprep.subr.bf16.mxu0 %v998_v51 }
  0x6a   :  { %933 = vmatpush3.bf16.msra.mxu1 %v1007_v2 }
  0x6b   :  { %934 = vmatprep.subr.bf16.mxu1 %v1118_v44 }
  0x6c   :  { %900 = vmatpush3.bf16.msra.mxu0 %v999_v52 }
  0x6d   :  { %901 = vmatprep.subr.bf16.mxu0 %v1000_v55 }
  0x6e   :  { %935 = vmatpush3.bf16.msra.mxu1 %v1008_v3 }
  0x6f   :  { %936 = vmatprep.subr.bf16.mxu1 %v1118_v44 }
  0x70   :  { %902 = vmatpush3.bf16.msra.mxu0 %v1001_v59 }
  0x71   :  { %903 = vmatprep.subr.bf16.mxu0 %v1002_v60 }
  0x72   :  { %937 = vmatpush3.bf16.msra.mxu1 %v1009_v4 }
  0x73   :  { %938 = vmatprep.subr.bf16.mxu1 %v1118_v44 }
  0x74   :  { %904 = vmatpush3.bf16.msra.mxu0 %v1003_v61 }
  0x76   :  { %939 = vmatpush3.bf16.msra.mxu1 %v1010_v5 }
  0x77   :  { %591 = vmatmul.mubr.bf16.vlgmr.msra.gmra.mrb[4].mxu0 %v72_v63  ;;  %940 = vmatprep.subr.bf16.mxu1 %v1118_v44 }
  0x7a   :  { %941 = vmatpush3.bf16.msra.mxu1 %v1011_v6 }
  0x7b   :  { %942 = vmatprep.subr.bf16.mxu1 %v1118_v44 }
  0x7e   :  { %943 = vmatpush3.bf16.msra.mxu1 %v1012_v7 }
 0x12a   :  { %v861_v8 = vpop.f32.mrb[0].mxu0 }
 0x12b   :  { %v862_v10 = vpop.f32.mrb[1].mxu0 }
 0x12c   :  { %v863_v11 = vadd.f32 %v862_v10, %v861_v8  ;;  %v864_v12 = vpop.f32.mrb[2].mxu0  ;;  %v883_v13 = vpop.f32.mrb[0].mxu1 }
 0x12d   :  { %v865_v14 = vpop.f32.mrb[3].mxu0  ;;  %v884_v16 = vpop.f32.mrb[1].mxu1 }
 0x12e   :  { %v513_v15 = vadd.f32 %v863_v11, %v783_v9  ;;  %v885_v17 = vadd.f32 %v884_v16, %v883_v13  ;;  %v886_v18 = vpop.f32.mrb[2].mxu1 }
 0x12f   :  { %v887_v19 = vpop.f32.mrb[3].mxu1 }
 0x130   :  { %v553_v20 = vadd.f32 %v885_v17, %v513_v15 }
 0x134   :  { %v632_v21 = vpop.f32.mrb[4].mxu1 }
 0x135   :  { %v926_v22 = vpop.f32.mrb[5].mxu1 }
 0x136   :  { %v635_v23 = vpop.f32.mrb[6].mxu1 }
 0x137   :  { %v927_v24 = vpop.f32.mrb[7].mxu1 }
 0x14a   :  { %v905_v25 = vpop.f32.mrb[4].mxu0 }
 0x14b   :  { %v906_v26 = vpop.f32.mrb[5].mxu0 }
 0x14c   :  { %v907_v27 = vadd.f32 %v906_v26, %v905_v25  ;;  %v908_v28 = vpop.f32.mrb[6].mxu0 }
 0x14d   :  { %v909_v29 = vpop.f32.mrb[7].mxu0 }
 0x14e   :  { %v593_v30 = vadd.f32 %v907_v27, %v553_v20 }
 0x150   :  { %v633_v31 = vadd.f32 %v632_v21, %v593_v30 }
 0x152   :  { %v638_v32 = vpack.c.bf16 %v633_v31, %v633_v31 }
 0x154   :  { %1013 = vtanh.bf16 %v638_v32 }
 0x15f   :  { %v1014_v33 = vpop.eup %1013 }
 0x160   :  { %945 = vmatmul.mubr.bf16.vlgmr.msra.gmra.mrb[8].mxu1 %v1014_v33 }
 0x233   :  { %v745_v37 = vpop.f32.mrb[8].mxu1 }
 0x234   :  { %v746_v38 = vadd.f32 %v834_v35, %v745_v37  ;;  %v946_v39 = vpop.f32.mrb[9].mxu1 }
 0x235   :  { %v748_v40 = vpop.f32.mrb[10].mxu1 }
 0x236   :  { %v754_v41 = vmul.f32 2.0, %v746_v38  ;;  %v947_v42 = vpop.f32.mrb[11].mxu1 }
 0x238   :  { %v755_v43 = vsel %vm753_vm2, %v754_v41, %v746_v38 }
 0x239   :  { %v843_v44 = vmul.f32 -1.442695, %v755_v43 }
 0x23b   :  { %1015 = vpow2.f32 %v843_v44 }
 0x245   :  { %v1016_v45 = vpop.eup %1015 }
 0x246   :  { %v759_v46 = vadd.f32 1.0, %v1016_v45 }
 0x248   :  { %1017 = vrcp.f32 %v759_v46 }
 0x252   :  { %v1018_v47 = vpop.eup %1017 }
 0x253   :  { %v762_v48 = vmul.f32 2.0, %v1018_v47 }
 0x255   :  { %v844_v49 = vadd.f32 -1.0, %v762_v48 }
 0x257   :  { %v764_v50 = vsel %vm753_vm2, %v844_v49, %v1018_v47 }
 0x258   :  { %v765_v51 = vpack.c.bf16 %v764_v50, %v764_v50 }
 0x25a   :  { %766 = vst [vmem:[#allocation8] sm:$0xf] %v765_v51 }
 0x25b   :  { %1096 = shalt.err (!%p1093_p0)
}
 0x25c   :  { %s1097_s10 = scalar_lea.hbm %s1229_s5, 64 }
 0x25d   :  { %p1098_p1 = scmp.ne.s32.totalorder %s1229_s5, %s1097_s10  ;;  %p1101_p2 = scmp.lt.u32.totalorder %s1097_s10, %s1229_s5 }
 0x25f   :  { %p1103_p3 = pnand %p1101_p2, %p1098_p1 }
 0x261   :  { %1106 = shalt.err (!%p1103_p3)
}
 0x262   :  { %776 = dma.vmem_to_hbm [thread:$0]  %s774_s7, 64, %s1229_s5, [#allocation4]  }
 0x263   :  { %1111 = dma.done.wait [#allocation4], 64  }
 0x264   :  { %1112 = vsyncadd [#allocation4], 4294967232 }
 0x265   :  { %780 = vsyncpa [#allocation3], 1 }
 0x266   :  { %781 = vsyncpa [#allocation6], 1 }
 0x267   :  { %782 = vsyncpa [#allocation4], 1 }

</bundles_post_ra>
